<compile_context>
chip_gen: v7x
topology: tpu7x:2x2x1
jax: 0.10.0
libtpu: 0.0.40
codegen_flags: <defaults>
</compile_context>

<pallas_src>
import jax
import jax.numpy as jnp
from jax.experimental import pallas as pl
from jax.experimental.pallas import tpu as pltpu

_MiB = 1024 * 1024


def _round_down(x: int, m: int) -> int:
    return (x // m) * m


def _round_up(x: int, m: int) -> int:
    return ((x + m - 1) // m) * m


def _vmem_capacity_bytes() -> int:
    """Physical VMEM per TensorCore; conservative (v7x = 64 MiB) if unknown."""
    try:
        info = pltpu.get_tpu_info()
        for attr in ("vmem_capacity_bytes", "vmem_size_bytes", "vmem_bytes"):
            v = getattr(info, attr, None)
            if v:
                return int(v)
    except Exception:
        pass
    return 64 * _MiB


def _pos_emb_broadcast_kernel(emb_ref, out_ref):
    # emb_ref : (1, t_lane)       lane tile of the flattened pos_emb[:S]
    # out_ref : (t_batch, t_lane) tile of the flattened (B, S*D) output
    if out_ref.shape[0] == emb_ref.shape[0]:
        out_ref[...] = emb_ref[...]                       # straight vld -> vst
    else:
        # Sublane replication. The kernel is writeback-DMA bound, so this VPU
        # copy is fully hidden behind the output DMA; broadcast_to is kept for
        # portability (a stride-0 dslice load would do the same at vld time).
        out_ref[...] = jnp.broadcast_to(emb_ref[...], out_ref.shape)


def positional_embedding_forward(h: jax.Array, pos_emb: jax.Array,
                                 *, target_block_bytes: int | None = None) -> jax.Array:
    """Returns pos_emb[:S] broadcast to (B, S, D), like the PyTorch module."""
    B, S = h.shape[0], h.shape[1]
    L, D = pos_emb.shape
    assert S <= L, "sequence length exceeds max_token_length"

    dtype = pos_emb.dtype
    itemsize = jnp.dtype(dtype).itemsize
    N = S * D

    # Plain-JAX glue: static slice + contiguous reshape (no data movement).
    emb_flat = pos_emb[:S].reshape(1, N)

    # ---- generation-aware block budget ------------------------------------
    vmem_physical = _vmem_capacity_bytes()
    if target_block_bytes is None:
        # v7x (64 MiB VMEM): 8 MiB blocks; v5e/v6e (128 MiB VMEM): 16 MiB.
        target_block_bytes = 8 * _MiB if vmem_physical <= 64 * _MiB else 16 * _MiB
    target_block_bytes = max(int(target_block_bytes), 8 * 128 * itemsize)

    # ---- tile selection -----------------------------------------------------
    # Lane tile: prefer full rows (t_lane == N) so every output DMA writes one
    # fully contiguous HBM range and the embedding is a single resident tile;
    # otherwise take the largest multiple of 128 lanes that keeps an 8-sublane
    # block within budget. cdiv grid masks the ragged edge, so t_lane need not
    # divide N.
    if 8 * N * itemsize <= target_block_bytes or N <= 128:
        t_lane = N
    else:
        t_lane = _round_down(target_block_bytes // (8 * itemsize), 128)
        t_lane = max(128, min(t_lane, _round_down(N, 128)))

    # Batch (sublane) tile: fill the remaining budget with rows; multiple of 8
    # or the full batch (ragged edge block masked by Pallas).
    rows = max(1, target_block_bytes // (t_lane * itemsize))
    if B <= rows or B <= 8:
        t_batch = B
    else:
        t_batch = max(8, _round_down(rows, 8))

    lane_tiles = pl.cdiv(N, t_lane)
    batch_tiles = pl.cdiv(B, t_batch)

    # Megacore: guarantee >= 2 blocks so both v7x TensorCores get work
    # (no effect on single-core v5e/v6e).
    if lane_tiles * batch_tiles == 1:
        if B >= 16:
            t_batch = _round_up(pl.cdiv(B, 2), 8)
            batch_tiles = pl.cdiv(B, t_batch)
        elif N >= 256:
            t_lane = _round_up(pl.cdiv(N, 2), 128)
            lane_tiles = pl.cdiv(N, t_lane)
        # else: the whole problem is a few KiB; a single block is fine.

    # Batch innermost -> emb tile's block index is constant across consecutive
    # steps, so pos_emb[:S] is DMA'd from HBM exactly once per lane tile.
    grid = (lane_tiles, batch_tiles)

    # VMEM budget: double-buffered output + double-buffered emb tile + margin.
    out_block_bytes = t_batch * t_lane * itemsize
    emb_block_bytes = t_lane * itemsize
    vmem_limit_bytes = 2 * out_block_bytes + 2 * emb_block_bytes + 4 * _MiB
    vmem_limit_bytes = max(16 * _MiB, min(vmem_limit_bytes, (vmem_physical * 3) // 4))

    out_flat = pl.pallas_call(
        _pos_emb_broadcast_kernel,
        out_shape=jax.ShapeDtypeStruct((B, N), dtype),
        grid_spec=pltpu.PrefetchScalarGridSpec(
            num_scalar_prefetch=0,
            grid=grid,
            in_specs=[
                # Embedding block index depends only on the lane-tile index;
                # when lane_tiles == 1 it is constant (single resident tile).
                pl.BlockSpec((1, t_lane), lambda f, b: (0, f)),
            ],
            # Default 2-deep output buffering: the kernel is sustained-HBM-write
            # bound, so extra VMEM goes into larger blocks, not deeper buffers.
            out_specs=pl.BlockSpec((t_batch, t_lane), lambda f, b: (b, f)),
        ),
        compiler_params=pltpu.CompilerParams(
            dimension_semantics=("parallel", "parallel"),
            vmem_limit_bytes=int(vmem_limit_bytes),
        ),
        cost_estimate=pl.CostEstimate(
            flops=0,
            transcendentals=0,
            bytes_accessed=(B * N + N) * itemsize,  # write B*S*D, read S*D once
        ),
    )(emb_flat)

    return out_flat.reshape(B, S, D)


if __name__ == "__main__":
    # Config mirroring the PyTorch module at small shapes.
    dim_model = 32
    max_token_length = 16
    B, S = 2, 8

    key = jax.random.PRNGKey(0)
    k_emb, k_h = jax.random.split(key)
    pos_emb = jax.random.uniform(k_emb, (max_token_length, dim_model), dtype=jnp.float32)
    # h's values are unused by the forward pass; only its (B, S) shape matters.
    h = jax.random.normal(k_h, (B, S, dim_model), dtype=jnp.float32)

    out = jax.block_until_ready(positional_embedding_forward(h, pos_emb))
    ref = jnp.broadcast_to(pos_emb[:S][None, :, :], (B, S, dim_model))
    assert out.shape == (B, S, dim_model)
    assert out.dtype == jnp.float32
    assert jnp.array_equal(out, ref)

    # Lane-tiled + multi-step path: tiny block budget forces several lane tiles.
    B2, S2, D2, L2 = 8, 16, 64, 32
    pos_emb2 = jax.random.uniform(jax.random.PRNGKey(1), (L2, D2), dtype=jnp.float32)
    h2 = jnp.zeros((B2, S2, D2), dtype=jnp.float32)
    out2 = jax.block_until_ready(
        positional_embedding_forward(h2, pos_emb2, target_block_bytes=4096))
    ref2 = jnp.broadcast_to(pos_emb2[:S2][None, :, :], (B2, S2, D2))
    assert jnp.array_equal(out2, ref2)

    # Ragged batch edge: B not a multiple of 8, S*D not a multiple of 128
    # (the old full-extent-fallback failure mode), batch axis split for v7x.
    B3, S3, D3, L3 = 20, 6, 48, 12
    pos_emb3 = jax.random.uniform(jax.random.PRNGKey(2), (L3, D3), dtype=jnp.float32)
    h3 = jnp.zeros((B3, S3, D3), dtype=jnp.float32)
    out3 = jax.block_until_ready(positional_embedding_forward(h3, pos_emb3))
    ref3 = jnp.broadcast_to(pos_emb3[:S3][None, :, :], (B3, S3, D3))
    assert jnp.array_equal(out3, ref3)

    # Ragged lane edge: S*D = 300 split into 256-lane tiles with a masked tail.
    B4, S4, D4, L4 = 2, 6, 50, 8
    pos_emb4 = jax.random.uniform(jax.random.PRNGKey(3), (L4, D4), dtype=jnp.float32)
    h4 = jnp.zeros((B4, S4, D4), dtype=jnp.float32)
    out4 = jax.block_until_ready(positional_embedding_forward(h4, pos_emb4))
    ref4 = jnp.broadcast_to(pos_emb4[:S4][None, :, :], (B4, S4, D4))
    assert jnp.array_equal(out4, ref4)

    # TODO(synk): no_decay_param_names is optimizer configuration, not part of
    # the forward pass, so it has no kernel equivalent.
    print("KERNEL_OK")
</pallas_src>

<mosaic_0001>
module attributes {stable_mosaic.version = 11 : i64} {
  func.func @_pos_emb_broadcast_kernel(%arg0: i32, %arg1: i32, %arg2: memref<1x128xf32, #tpu.memory_space<vmem>>, %arg3: memref<2x128xf32, #tpu.memory_space<vmem>>) attributes {dimension_semantics = [#tpu.dimension_semantics<parallel>, #tpu.dimension_semantics<parallel>], iteration_bounds = array<i64: 2, 1>, scalar_prefetch = 0 : i64, scratch_operands = 0 : i64, tpu.core_type = #tpu.core_type<tc>, window_params = [{transform_indices = @transform_0, window_bounds = array<i64: 1, 128>}, {transform_indices = @transform_1, window_bounds = array<i64: 2, 128>}]} {
    %c0 = arith.constant 0 : index
    %c0_0 = arith.constant 0 : index
    %0 = vector.load %arg2[%c0, %c0_0] : memref<1x128xf32, #tpu.memory_space<vmem>>, vector<1x128xf32>
    %1 = vector.shape_cast %0 : vector<1x128xf32> to vector<1x128xf32>
    %2 = vector.broadcast %1 : vector<1x128xf32> to vector<2x128xf32>
    %c0_1 = arith.constant 0 : index
    %c0_2 = arith.constant 0 : index
    %3 = vector.load %arg3[%c0_1, %c0_2] : memref<2x128xf32, #tpu.memory_space<vmem>>, vector<2x128xf32>
    tpu.vector_store %arg3[%c0_1, %c0_2], %2 {strides = array<i32>} : memref<2x128xf32, #tpu.memory_space<vmem>>, vector<2x128xf32>,
    return
  }
  func.func @transform_0(%arg0: i32, %arg1: i32) -> (i32, i32) {
    %c0_i32 = arith.constant 0 : i32
    %c0_i32_0 = arith.constant 0 : i32
    return %c0_i32, %arg0 : i32, i32
  }
  func.func @transform_1(%arg0: i32, %arg1: i32) -> (i32, i32) {
    %c0_i32 = arith.constant 0 : i32
    return %arg1, %arg0 : i32, i32
  }
}

</mosaic_0001>

<bundles_post_ra>
// kernel: tpu_custom_call.1
= control target key start
LH: loop header
LB: loop body
LE: loop exit
PB: predicated region body
PF: predicated region fallthrough
CT: control target
= control target key end

     0   :  { %6 = vsyncpa [#allocation3], 0  ;;  %s617_s0 = inlined_call_operand.hbm [shape: f32[1,256], index: 0, kind: input, shape index: {}]   ;;  %s618_s1 = inlined_call_operand.hbm [shape: f32[2,256], index: 1, kind: output, shape index: {}]  }
   0x1   :  { %8 = vsyncpa [#allocation3 + $0x1], 0 }
   0x2   :  { %9 = vsyncpa [#allocation4], 0 }
   0x3   :  { %11 = vsyncpa [#allocation4 + $0x1], 0  ;;  %s444_s6 = smov 0   ;;  %s446_s7 = smov 0  }
   0x4   :  { %s448_s8 = smov 0   ;;  %s450_s9 = smov 0  }
   0x5   :  { %s452_s10 = smov 0   ;;  %s454_s11 = smov 0  }
   0x6 LB: > { %s244_s12 = sadd.s32 4294967295, %s430_s11   ;;  %s245_s13 = sadd.s32 4294967294, %s430_s11   ;;  %s430_s11 = sphi %s454_s11, %s17_s11   ;;  %s426_s10 = sphi %s452_s10, %s634_s10   ;;  %s422_s9 = sphi %s450_s9, %s633_s9   ;;  %s418_s8 = sphi %s448_s8, %s632_s8   ;;  %s414_s7 = sphi %s446_s7, %s631_s7   ;;  %s410_s6 = sphi %s444_s6, %s630_s6  }
   0x7   : > { %s29_s14 = sadd.s32 1, %s426_s10  ;;  %s36_s15 = sadd.s32 1, %s418_s8 }
   0x8   : > { %p31_p0 = scmp.ge.s32.totalorder %s29_s14, 2  ;;  %p43_p1 = scmp.ne.s32.totalorder %s418_s8, %s414_s7 }
   0x9   : > { %p44_p2 = scmp.eq.s32.totalorder %s430_s11, 0  ;;  %p49_p3 = scmp.ne.s32.totalorder %s414_s7, %s410_s6 }
   0xa   : > { %s636_s14 = smov (%p31_p0, %s29_s14), 0  ;;  %p50_p5 = scmp.eq.s32.totalorder %s244_s12, 0 }
   0xb   : > { %p485_p4 = por %p44_p2, %p43_p1  ;;  %s33_s17 = ssub.s32 %s426_s10, %s636_s14 }
   0xc   : > { %p75_p6 = scmp.eq.s32.totalorder %s244_s12, 1  ;;  %p34_p7 = scmp.eq.s32.totalorder %s33_s17, 0 }
   0xd   : > { %p491_p8 = por %p50_p5, %p49_p3  ;;  %p81_p10 = scmp.eq.s32.totalorder %s245_s13, 1 }
   0xe   : > { %p495_p9 = por %p75_p6, %p43_p1  ;;  %p268_p13 = scmp.lt.s32.totalorder %s430_s11, 2 }
   0xf   : > { %s500_s20 = scalar_select %p34_p7, %s418_s8, %s36_s15  }
  0x10   : > { %s622_s19 = scalar_select %p495_p9, 1, 0 }
  0x11   : > { %p502_p11 = por %p81_p10, %p49_p3  ;;  %s101_s22 = sand.u32 1, %s418_s8  }
  0x12   : > { %s248_s23 = sshll.u32 %s426_s10, 4  ;;  %s104_s24 = scalar_lea.vmem [#allocation2], %s101_s22 }
  0x13   : > { %s623_s21 = scalar_select %p502_p11, 1, 0 }
  0x14   : > { %s111_s25 = sshll.u32 %s104_s24, 4  ;;  %s513_s28 = scalar_lea.hbm %s617_s0, %s248_s23  ;;  %s515_s25 = int_to_ptr.vmem [resolvable:$true] %s111_s25 }
  0x15   : > { %p519_p0 = pnand %p268_p13, %p485_p4  ;;  %s102_s30 = scalar_lea.sflag [#allocation3], %s101_s22 }
  0x16   : > { %s318_s2 = scalar_lea.hbm %s513_s28, 16  ;;  %s323_s5 = scalar_lea.hbm %s617_s0, 32 }
  0x17   : > { %p319_p3 = scmp.ne.s32.totalorder %s513_s28, %s318_s2  ;;  %p320_p5 = pneg %p519_p0 }
  0x18   : > { %p324_p4 = scmp.lt.u32.totalorder %s513_s28, %s617_s0  ;;  %p325_p10 = scmp.lt.u32.totalorder %s323_s5, %s318_s2 }
  0x19   : > { %p321_p6 = pnand %p320_p5, %p319_p3  ;;  %p327_p12 = scmp.lt.u32.totalorder %s318_s2, %s513_s28 }
  0x1a   : > { %p326_p13 = por %p325_p10, %p324_p4 }
  0x1b   : > { %p322_p7 = pneg %p321_p6 }
  0x1c   : > { %p328_p1 = por %p327_p12, %p326_p13 }
  0x1e   : > { %p329_p2 = pnand %p328_p1, %p322_p7 }
  0x20   : > { %332 = shalt.err (!%p329_p2)
}
  0x21   : > { %s333_s15 = scalar_lea.vmem %s515_s25, 16  ;;  %s432_s16 = smov [#allocation2]  }
  0x22   : > { %p334_p3 = scmp.ne.s32.totalorder %s515_s25, %s333_s15  ;;  %s338_s17 = sshll.u32 %s432_s16, 4  ;;  %s339_s17 = int_to_ptr.vmem [resolvable:$false] %s338_s17 }
  0x23   : > { %s340_s22 = scalar_lea.vmem %s339_s17, 32  ;;  %p341_p9 = scmp.lt.s32.totalorder %s515_s25, %s339_s17 }
  0x24   : > { %p336_p6 = pnand %p334_p3, %p320_p5  ;;  %p342_p4 = scmp.lt.s32.totalorder %s340_s22, %s333_s15 }
  0x26   : > { %p337_p11 = pneg %p336_p6  ;;  %p343_p10 = por %p342_p4, %p341_p9 }
  0x28   : > { %p344_p12 = pnand %p343_p10, %p337_p11 }
  0x2a   : > { %347 = shalt.err (!%p344_p12)
}
  0x2b   : > { %263 = dma.hbm_to_vmem [thread:$0]  (!%p519_p0), %s513_s28, 16, %s515_s25, %s102_s30  }
  0x2c   : > { %p625_p1 = scmp.lt.s32.totalorder %s430_s11, 3  ;;  %p626_p2 = scmp.ge.s32.totalorder %s430_s11, 1 }
  0x2e   : > { %p117_p5 = pnand %p626_p2, %p625_p1 }
  0x2f   : > { %s555_s23 = sand.u32 (!%p117_p5), 1, %s414_s7  }
  0x30   : > { %120 = sbr.rel (%p117_p5) target bundleno = 82 (0x52), region = 24  ;;  %s123_s24 = scalar_lea.sflag (!%p117_p5), [#allocation3], %s555_s23 }
  0x31   : > { %s125_s26 = scalar_lea.vmem (!%p117_p5), [#allocation2], %s555_s23 }
  0x37   : > { %401 = dma.done.wait (%p491_p8), %s123_s24, 16  }
  0x38   : > { %403 = vsyncadd (%p491_p8), %s123_s24, 4294967280  ;;  %s250_s25 = sshll.u32 %s555_s23, 1  ;;  %s253_s29 = sshll.u32 %s422_s9, 5  ;;  %v251_v0 = vld [vmem:[%s125_s26] ss:$0 sm:$0xff] }
  0x39   : > { %s142_s27 = scalar_lea.vmem [#allocation5], %s250_s25  ;;  %s570_s3 = scalar_lea.hbm %s618_s1, %s253_s29 }
  0x3a   : > { %s167_s28 = sshll.u32 %s142_s27, 4  ;;  %150 = vst [vmem:[%s142_s27] sm:$0x3] %v251_v0  ;;  %s152_s18 = scalar_lea.sflag [#allocation4], %s555_s23  ;;  %s565_s28 = int_to_ptr.vmem [resolvable:$true] %s167_s28 }
  0x3b   : > { %s348_s4 = scalar_lea.vmem %s565_s28, 32  ;;  %p627_p9 = scmp.ne.s32.totalorder %s622_s19, 0 }
  0x3c   : > { %p349_p8 = scmp.ne.s32.totalorder %s565_s28, %s348_s4  ;;  %s433_s5 = smov [#allocation5]  }
  0x3d   : > { %s352_s9 = sshll.u32 %s433_s5, 4  ;;  %s353_s9 = int_to_ptr.vmem [resolvable:$false] %s352_s9 }
  0x3e   : > { %p350_p11 = pnand %p349_p8, %p627_p9  ;;  %s354_s12 = scalar_lea.vmem %s353_s9, 64 }
  0x3f   : > { %p355_p7 = scmp.lt.s32.totalorder %s565_s28, %s353_s9  ;;  %p356_p13 = scmp.lt.s32.totalorder %s354_s12, %s348_s4 }
  0x40   : > { %p351_p0 = pneg %p350_p11 }
  0x41   : > { %p357_p3 = por %p356_p13, %p355_p7 }
  0x43   : > { %p358_p6 = pnand %p357_p3, %p351_p0 }
  0x45   : > { %361 = shalt.err (!%p358_p6)
}
  0x46   : > { %s362_s13 = scalar_lea.hbm %s570_s3, 32  ;;  %s366_s17 = scalar_lea.hbm %s618_s1, 64 }
  0x47   : > { %p363_p4 = scmp.ne.s32.totalorder %s570_s3, %s362_s13  ;;  %p367_p1 = scmp.lt.u32.totalorder %s570_s3, %s618_s1 }
  0x48   : > { %p368_p2 = scmp.lt.u32.totalorder %s366_s17, %s362_s13  ;;  %p370_p8 = scmp.lt.u32.totalorder %s362_s13, %s570_s3 }
  0x49   : > { %p364_p10 = pnand %p363_p4, %p627_p9 }
  0x4a   : > { %p369_p5 = por %p368_p2, %p367_p1 }
  0x4b   : > { %p365_p12 = pneg %p364_p10 }
  0x4c   : > { %p371_p11 = por %p370_p8, %p369_p5 }
  0x4e   : > { %p372_p0 = pnand %p371_p11, %p365_p12 }
  0x50   : > { %375 = shalt.err (!%p372_p0)
}
  0x51   : > { %258 = dma.vmem_to_hbm [thread:$0]  (%p627_p9), %s565_s28, 32, %s570_s3, %s152_s18  }
  0x52 PF: > { %s179_s24 = sand.u32 1, %s410_s6   ;;  %p628_p7 = scmp.ne.s32.totalorder %s623_s21, 0 }
  0x53   : > { %p629_p13 = scmp.ge.s32.totalorder %s430_s11, 2  ;;  %s180_s26 = scalar_lea.sflag [#allocation4], %s179_s24 }
  0x55   : > { %p265_p3 = pnand %p629_p13, %p628_p7 }
  0x57   : > { %405 = dma.done.wait (!%p265_p3), %s180_s26, 32  }
  0x58   : > { %407 = vsyncadd (!%p265_p3), %s180_s26, 4294967264  ;;  %s17_s11 = sadd.s32 1, %s430_s11   ;;  %s630_s6 = smov %s414_s7 }
  0x59   : > { %p14_p6 = scmp.ge.s32.totalorder %s17_s11, 4   ;;  %s631_s7 = smov %s418_s8 }
  0x5a   : > { %s632_s8 = smov %s500_s20  ;;  %s633_s9 = smov %s426_s10 }
  0x5b   : > { %s634_s10 = smov %s636_s14  ;;  %16 = sbr.rel (!%p14_p6) target bundleno = 6 (0x6), region = 69 }
  0x62   :  { %185 = vsyncpa [#allocation3], 1 }
  0x63   :  { %187 = vsyncpa [#allocation3 + $0x1], 1 }
  0x64   :  { %188 = vsyncpa [#allocation4], 1 }
  0x65   :  { %190 = vsyncpa [#allocation4 + $0x1], 1 }

</bundles_post_ra>
